<compile_context>
chip_gen: v7x
topology: tpu7x:2x2x1
jax: 0.10.0
libtpu: 0.0.40
codegen_flags: <defaults>
</compile_context>

<pallas_src>
import functools
import numpy as np
import jax
import jax.numpy as jnp
from jax.experimental import pallas as pl
from jax.experimental.pallas import tpu as pltpu


# ---------------------------------------------------------------------------
# Host-side construction of the (static-shape) interpolation matrices.
# ---------------------------------------------------------------------------

def _bilinear_matrix(out_size: int, in_size: int) -> np.ndarray:
    """Interpolation matrix M (out_size, in_size): resized = M @ x (1-D)."""
    M = np.zeros((out_size, in_size), dtype=np.float32)
    if out_size == in_size:
        np.fill_diagonal(M, 1.0)
        return M
    scale = in_size / out_size
    for j in range(out_size):
        src = (j + 0.5) * scale - 0.5
        src = max(src, 0.0)                     # PyTorch clamps source coord at 0
        i0 = int(np.floor(src))
        i0 = min(i0, in_size - 1)
        i1 = min(i0 + 1, in_size - 1)
        w1 = src - i0
        w0 = 1.0 - w1
        M[j, i0] += w0
        M[j, i1] += w1
    return M


def _padded_resize_matrix(full: int, out: int, pad: int) -> np.ndarray:
    """(full, full) matrix: rows [pad, pad+out) hold the bilinear weights."""
    M = np.zeros((full, full), dtype=np.float32)
    M[pad:pad + out, :] = _bilinear_matrix(out, full)
    return M


@functools.lru_cache(maxsize=None)
def _build_constants(h, w, out_h, out_w, pad_top, pad_left, fill, mat_dtype_name):
    """Device-resident P_h, P_w^T and fill mask, cached per discrete scale."""
    mat_dt = jnp.dtype(mat_dtype_name)
    ph = _padded_resize_matrix(h, out_h, pad_top)            # (H, H)
    pw = _padded_resize_matrix(w, out_w, pad_left)           # (W, W)
    mask = np.full((h, w), float(fill), dtype=np.float32)
    mask[pad_top:pad_top + out_h, pad_left:pad_left + out_w] = 0.0
    return (jnp.asarray(ph, dtype=mat_dt),
            jnp.asarray(np.ascontiguousarray(pw.T), dtype=mat_dt),
            jnp.asarray(mask))                               # fill kept in f32


# ---------------------------------------------------------------------------
# Kernel.
# ---------------------------------------------------------------------------

def _resize_pad_kernel(x_ref, ph_ref, pwt_ref, fill_ref, o_ref):
    # x_ref/o_ref : (B, H, W)  batch of image planes, natural layout
    # ph_ref      : (H, H)     height resize+pad matrix (rows = output rows)
    # pwt_ref     : (W, W)     transposed width resize+pad matrix
    # fill_ref    : (H, W)     fill value on the border, 0 in the interior
    b, h, w = x_ref.shape
    x = x_ref[...]                                           # native dtype -> MXU
    pwt_b = jnp.broadcast_to(pwt_ref[...], (b, w, w))
    ph_b = jnp.broadcast_to(ph_ref[...], (b, h, h))
    # Width contraction, then height contraction, both batched MXU matmuls.
    t = jnp.einsum('bkl,blj->bkj', x, pwt_b,
                   preferred_element_type=jnp.float32)       # (B, H, W)
    r = jnp.einsum('bik,bkj->bij', ph_b, t,
                   preferred_element_type=jnp.float32)       # (B, H, W)
    o_ref[...] = (r + fill_ref[...]).astype(o_ref.dtype)


# ---------------------------------------------------------------------------
# Tiling / VMEM policy.
# ---------------------------------------------------------------------------

@functools.lru_cache(maxsize=None)
def _vmem_limit_bytes() -> int:
    """Generation-aware VMEM limit (60% of per-core capacity, capped)."""
    try:
        cap = int(pltpu.get_tpu_info().vmem_capacity_bytes)
    except Exception:
        cap = 64 * 1024 * 1024          # conservative default (v7x per-TC)
    return min(int(cap * 0.6), 96 * 1024 * 1024)


def _choose_batch(nc: int, h: int, w: int, itemsize: int, budget: int) -> int:
    """Largest divisor B of nc (capped at nc//2 so the parallel grid axis has
    >= 2 steps) whose per-step working set fits the VMEM budget, accounting
    for default double-buffering of every input/output."""
    cap = max(1, nc // 2)

    def fits(b: int) -> bool:
        slab = b * h * w * itemsize                       # one image block
        consts = (h * h + w * w) * itemsize + h * w * 4   # P_h, P_w^T, mask
        temps = b * (h * h + w * w) * itemsize + 2 * b * h * w * 4
        # in + out double-buffered, constants double-buffered, kernel temps.
        return 2 * slab + 2 * slab + 2 * consts + temps <= budget

    best = 1
    for b in range(1, cap + 1):
        if nc % b == 0 and fits(b):
            best = b
    return best


@functools.lru_cache(maxsize=None)
def _build_pallas_call(nc: int, h: int, w: int, b: int,
                       dtype_name: str, mat_dtype_name: str, vmem_limit: int):
    grid = nc // b
    dt = jnp.dtype(dtype_name)
    mat_dt = jnp.dtype(mat_dtype_name)
    flops = 2 * nc * (h * h * w + h * w * w)
    bytes_accessed = (2 * nc * h * w * dt.itemsize
                      + (h * h + w * w) * mat_dt.itemsize + h * w * 4)
    return pl.pallas_call(
        _resize_pad_kernel,
        out_shape=jax.ShapeDtypeStruct((nc, h, w), dt),
        grid_spec=pltpu.PrefetchScalarGridSpec(
            num_scalar_prefetch=0,
            grid=(grid,),
            in_specs=[
                pl.BlockSpec((b, h, w), lambda i: (i, 0, 0)),   # image planes
                pl.BlockSpec((h, h), lambda i: (0, 0)),         # P_h (resident)
                pl.BlockSpec((w, w), lambda i: (0, 0)),         # P_w^T (resident)
                pl.BlockSpec((h, w), lambda i: (0, 0)),         # fill mask
            ],
            out_specs=pl.BlockSpec((b, h, w), lambda i: (i, 0, 0)),
        ),
        compiler_params=pltpu.CompilerParams(
            dimension_semantics=("parallel",),
            vmem_limit_bytes=vmem_limit),
        cost_estimate=pl.CostEstimate(
            flops=flops, transcendentals=0, bytes_accessed=bytes_accessed),
    )


def _resize_with_pad_pallas(img, *, out_h, out_w, pad_top, pad_left, fill):
    """img: (N, C, H, W) floating. Bilinear-resize to (out_h, out_w), constant-
    pad back to (H, W) with `fill`."""
    if not jnp.issubdtype(img.dtype, jnp.floating):
        # TODO(synk): integer dtypes need round + clamp semantics.
        raise TypeError('RandomResizeWithPad Pallas kernel supports floating '
                        'image dtypes only, got %s' % jnp.dtype(img.dtype).name)
    N, C, H, W = img.shape
    nc = N * C
    itemsize = jnp.dtype(img.dtype).itemsize
    vmem_limit = _vmem_limit_bytes()
    B = _choose_batch(nc, H, W, itemsize, int(vmem_limit * 0.8))

    # bf16 images get bf16 matrices (native MXU path); everything else f32.
    mat_dt = (jnp.bfloat16 if jnp.dtype(img.dtype) == jnp.dtype(jnp.bfloat16)
              else jnp.float32)
    ph, pwt, fill_mask = _build_constants(
        H, W, int(out_h), int(out_w), int(pad_top), int(pad_left), int(fill),
        jnp.dtype(mat_dt).name)

    # Natural layout, no transposes: (N, C, H, W) -> (NC, H, W) is free.
    x = img.reshape(nc, H, W)
    call = _build_pallas_call(nc, H, W, B, jnp.dtype(img.dtype).name,
                              jnp.dtype(mat_dt).name, vmem_limit)
    out = call(x, ph, pwt, fill_mask)
    return out.reshape(N, C, H, W)


# ---------------------------------------------------------------------------
# Module wrapper (mirrors the PyTorch RandomResizeWithPad).
# ---------------------------------------------------------------------------

class RandomResizeWithPad:
    """JAX/Pallas port of the PyTorch RandomResizeWithPad module."""

    def __init__(self, scale, p=0.5, fill_value=256, padding_mode='constant'):
        if not isinstance(scale, tuple):
            raise TypeError('Got inappropriate scale arg')
        if not isinstance(fill_value, int):
            raise TypeError('Got inappropriate fill_value arg')
        if padding_mode not in ['constant', 'edge', 'reflect', 'symmetric']:
            raise ValueError('Padding mode should be either constant, edge, '
                             'reflect or symmetric')
        self.scale = scale
        self.p = p
        self.fill_value = fill_value
        self.padding_mode = padding_mode

    def _get_params(self, img, key):
        # F._get_image_size returns (w, h)
        h, w = img.shape[-2], img.shape[-1]
        lo, hi = int(self.scale[0] * 100), int(self.scale[1] * 100)
        # Single host-side scalar pull, mirroring torch.randint(...).item().
        i = int(jax.random.randint(key, (1,), lo, hi)[0]) / 100
        pad_h = int((h - h * i) / 2)
        pad_w = int((w - w * i) / 2)
        resize_h = h - 2 * pad_h
        resize_w = w - 2 * pad_w
        return resize_w, resize_h, pad_w, pad_h

    def __call__(self, img, key):
        k_apply, k_scale = jax.random.split(key)
        # Host-side Bernoulli, mirroring `if torch.rand(1) < self.p`.
        apply = float(jax.random.uniform(k_apply, (1,))[0]) < self.p
        if not apply:
            return img
        resize_w, resize_h, pad_w, pad_h = self._get_params(img, k_scale)
        # Reference quirk (kept on purpose): resized height = resize_w,
        # resized width = resize_h; top/bottom pad = pad_h, left/right = pad_w.
        return _resize_with_pad_pallas(
            img,
            out_h=resize_w, out_w=resize_h,
            pad_top=pad_h, pad_left=pad_w,
            fill=self.fill_value)


if __name__ == "__main__":
    key = jax.random.PRNGKey(0)
    k_img, k_xform = jax.random.split(key)

    N, C, H, W = 2, 4, 16, 16
    img = jax.random.uniform(k_img, (N, C, H, W), dtype=jnp.float32) * 255.0

    # p=1.0 so the resize+pad kernel path is always exercised; scale range
    # chosen so the pad is always >= 1 pixel.
    xform = RandomResizeWithPad(scale=(0.5, 0.8), p=1.0, fill_value=256,
                                padding_mode='constant')
    out = xform(img, k_xform)
    out = jax.block_until_ready(out)

    assert out.shape == img.shape and out.dtype == img.dtype

    # Independent per-plane reference (plain numpy) with the same parameters.
    _, k_scale = jax.random.split(k_xform)
    resize_w, resize_h, pad_w, pad_h = xform._get_params(img, k_scale)
    ph_np = _padded_resize_matrix(H, resize_w, pad_h)
    pw_np = _padded_resize_matrix(W, resize_h, pad_w)
    mask_np = np.full((H, W), 256.0, dtype=np.float32)
    mask_np[pad_h:pad_h + resize_w, pad_w:pad_w + resize_h] = 0.0
    x_np = np.asarray(img)
    ref = np.empty_like(x_np)
    for n in range(N):
        for c in range(C):
            ref[n, c] = ph_np @ x_np[n, c] @ pw_np.T + mask_np
    np.testing.assert_allclose(np.asarray(out), ref, rtol=1e-5, atol=1e-3)

    # Border must be the fill value.
    assert float(out[0, 0, 0, 0]) == 256.0
    print("KERNEL_OK")
</pallas_src>

<mosaic_0001>
module attributes {stable_mosaic.version = 11 : i64} {
  func.func @_resize_pad_kernel(%arg0: i32, %arg1: memref<4x16x16xf32, #tpu.memory_space<vmem>>, %arg2: memref<16x16xf32, #tpu.memory_space<vmem>>, %arg3: memref<16x16xf32, #tpu.memory_space<vmem>>, %arg4: memref<16x16xf32, #tpu.memory_space<vmem>>, %arg5: memref<4x16x16xf32, #tpu.memory_space<vmem>>) attributes {dimension_semantics = [#tpu.dimension_semantics<parallel>], iteration_bounds = array<i64: 2>, scalar_prefetch = 0 : i64, scratch_operands = 0 : i64, tpu.core_type = #tpu.core_type<tc>, window_params = [{transform_indices = @transform_0, window_bounds = array<i64: 4, 16, 16>}, {pipeline_mode = #tpu.pipeline_mode<synchronous>, transform_indices = @transform_1, window_bounds = array<i64: 16, 16>}, {pipeline_mode = #tpu.pipeline_mode<synchronous>, transform_indices = @transform_2, window_bounds = array<i64: 16, 16>}, {pipeline_mode = #tpu.pipeline_mode<synchronous>, transform_indices = @transform_3, window_bounds = array<i64: 16, 16>}, {transform_indices = @transform_4, window_bounds = array<i64: 4, 16, 16>}]} {
    %c0 = arith.constant 0 : index
    %c0_0 = arith.constant 0 : index
    %c0_1 = arith.constant 0 : index
    %0 = vector.load %arg1[%c0, %c0_0, %c0_1] : memref<4x16x16xf32, #tpu.memory_space<vmem>>, vector<4x16x16xf32>
    %c0_2 = arith.constant 0 : index
    %c0_3 = arith.constant 0 : index
    %1 = vector.load %arg3[%c0_2, %c0_3] : memref<16x16xf32, #tpu.memory_space<vmem>>, vector<16x16xf32>
    %2 = vector.shape_cast %1 : vector<16x16xf32> to vector<1x16x16xf32>
    %3 = vector.broadcast %2 : vector<1x16x16xf32> to vector<4x16x16xf32>
    %c0_4 = arith.constant 0 : index
    %c0_5 = arith.constant 0 : index
    %4 = vector.load %arg2[%c0_4, %c0_5] : memref<16x16xf32, #tpu.memory_space<vmem>>, vector<16x16xf32>
    %5 = vector.shape_cast %4 : vector<16x16xf32> to vector<1x16x16xf32>
    %6 = vector.broadcast %5 : vector<1x16x16xf32> to vector<4x16x16xf32>
    "tpu.trace_start"() <{level = 10 : i32, message = "bkl,blj->bkj"}> : () -> ()
    %cst = arith.constant dense<0.000000e+00> : vector<4x16x16xf32>
    %7 = tpu.matmul %0, %3, %cst {dimension_numbers = #tpu.dot_dimension_numbers<[2], [1], [1], [2], [0, 0, 0, 1, 1, 2], [0], [0]>} : vector<4x16x16xf32>, vector<4x16x16xf32>, vector<4x16x16xf32> -> vector<4x16x16xf32>
    "tpu.trace_stop"() : () -> ()
    "tpu.trace_start"() <{level = 10 : i32, message = "bik,bkj->bij"}> : () -> ()
    %cst_6 = arith.constant dense<0.000000e+00> : vector<4x16x16xf32>
    %8 = tpu.matmul %6, %7, %cst_6 {dimension_numbers = #tpu.dot_dimension_numbers<[2], [1], [1], [2], [0, 0, 0, 1, 1, 2], [0], [0]>} : vector<4x16x16xf32>, vector<4x16x16xf32>, vector<4x16x16xf32> -> vector<4x16x16xf32>
    "tpu.trace_stop"() : () -> ()
    %c0_7 = arith.constant 0 : index
    %c0_8 = arith.constant 0 : index
    %9 = vector.load %arg4[%c0_7, %c0_8] : memref<16x16xf32, #tpu.memory_space<vmem>>, vector<16x16xf32>
    %10 = vector.shape_cast %9 : vector<16x16xf32> to vector<1x16x16xf32>
    %11 = vector.broadcast %10 : vector<1x16x16xf32> to vector<4x16x16xf32>
    %12 = arith.addf %8, %11 : vector<4x16x16xf32>
    %c0_9 = arith.constant 0 : index
    %c0_10 = arith.constant 0 : index
    %c0_11 = arith.constant 0 : index
    %13 = vector.load %arg5[%c0_9, %c0_10, %c0_11] : memref<4x16x16xf32, #tpu.memory_space<vmem>>, vector<4x16x16xf32>
    tpu.vector_store %arg5[%c0_9, %c0_10, %c0_11], %12 {strides = array<i32>} : memref<4x16x16xf32, #tpu.memory_space<vmem>>, vector<4x16x16xf32>,
    return
  }
  func.func @transform_0(%arg0: i32) -> (i32, i32, i32) {
    %c0_i32 = arith.constant 0 : i32
    %c0_i32_0 = arith.constant 0 : i32
    %c0_i32_1 = arith.constant 0 : i32
    return %arg0, %c0_i32, %c0_i32_0 : i32, i32, i32
  }
  func.func @transform_1(%arg0: i32) -> (i32, i32) {
    %c0_i32 = arith.constant 0 : i32
    %c0_i32_0 = arith.constant 0 : i32
    %c0_i32_1 = arith.constant 0 : i32
    return %c0_i32, %c0_i32_0 : i32, i32
  }
  func.func @transform_2(%arg0: i32) -> (i32, i32) {
    %c0_i32 = arith.constant 0 : i32
    %c0_i32_0 = arith.constant 0 : i32
    %c0_i32_1 = arith.constant 0 : i32
    return %c0_i32, %c0_i32_0 : i32, i32
  }
  func.func @transform_3(%arg0: i32) -> (i32, i32) {
    %c0_i32 = arith.constant 0 : i32
    %c0_i32_0 = arith.constant 0 : i32
    %c0_i32_1 = arith.constant 0 : i32
    return %c0_i32, %c0_i32_0 : i32, i32
  }
  func.func @transform_4(%arg0: i32) -> (i32, i32, i32) {
    %c0_i32 = arith.constant 0 : i32
    %c0_i32_0 = arith.constant 0 : i32
    %c0_i32_1 = arith.constant 0 : i32
    return %arg0, %c0_i32, %c0_i32_0 : i32, i32, i32
  }
}

</mosaic_0001>

<bundles_post_ra>
// kernel: tpu_custom_call.1
= control target key start
LH: loop header
LB: loop body
LE: loop exit
PB: predicated region body
PF: predicated region fallthrough
CT: control target
= control target key end

     0   :  { %9 = vsyncpa [#allocation3], 0  ;;  %s1799_s0 = inlined_call_operand.hbm [shape: f32[8,16,16], index: 0, kind: input, shape index: {}]   ;;  %s1800_s1 = inlined_call_operand.hbm [shape: f32[16,16], index: 1, kind: input, shape index: {}]   ;;  %s1801_s2 = inlined_call_operand.hbm [shape: f32[16,16], index: 2, kind: input, shape index: {}]   ;;  %s1802_s3 = inlined_call_operand.hbm [shape: f32[16,16], index: 3, kind: input, shape index: {}]   ;;  %s1803_s4 = inlined_call_operand.hbm [shape: f32[8,16,16], index: 4, kind: output, shape index: {}]  }
   0x1   :  { %11 = vsyncpa [#allocation3 + $0x1], 0 }
   0x2   :  { %12 = vsyncpa [#allocation6], 0 }
   0x3   :  { %13 = vsyncpa [#allocation9], 0 }
   0x4   :  { %14 = vsyncpa [#allocation4], 0 }
   0x5   :  { %16 = vsyncpa [#allocation4 + $0x1], 0  ;;  %s1500_s15 = smov 0   ;;  %s1502_s16 = smov 0  }
   0x6   :  { %s1504_s17 = smov 0   ;;  %s1506_s18 = smov 0  }
   0x7 LB: > { %s1521_s19 = sadd.s32 4294967295, %s1464_s18   ;;  %s1033_s20 = sadd.s32 4294967294, %s1464_s18   ;;  %s1464_s18 = sphi %s1506_s18, %s1826_s18   ;;  %s1460_s17 = sphi %s1504_s17, %s1825_s17   ;;  %s1456_s16 = sphi %s1502_s16, %s1824_s16   ;;  %s1452_s15 = sphi %s1500_s15, %s1823_s15  }
   0x8   : > { %p42_p0 = scmp.ne.s32.totalorder %s1456_s16, %s1452_s15  ;;  %p1804_p1 = scmp.eq.s32.totalorder %s1521_s19, 0 }
   0x9   : > { %p135_p3 = scmp.eq.s32.totalorder %s1033_s20, 1  ;;  %p1034_p5 = scmp.ge.s32.totalorder %s1464_s18, 1 }
   0xa   : > { %p1530_p4 = por %p1804_p1, %p42_p0  ;;  %p142_p7 = scmp.lt.s32.totalorder %s1464_s18, 3 }
   0xb   : > { %p1535_p6 = por %p135_p3, %p42_p0  ;;  %s1466_s24 = smov [#allocation5]  }
   0xc   : > { %s1807_s21 = scalar_select %p1530_p4, 1, 0 }
   0xd   : > { %s1808_s22 = scalar_select %p1535_p6, 1, 0 }
   0xe   : > { %p1540_p8 = pnand %p1034_p5, %p142_p7  ;;  %s154_s25 = sshll.u32 %s1466_s24, 4  ;;  %s1544_s25 = int_to_ptr.vmem [resolvable:$true] %s154_s25 }
   0xf   : > { %s1467_s27 = smov [#allocation7]   ;;  %s1468_s29 = smov [#allocation8]  }
  0x10   : > { %s1809_s23 = scalar_select %p1540_p8, 1, 0 }
  0x11   : > { %p1211_p9 = pneg %p1540_p8  ;;  %s167_s28 = sshll.u32 %s1467_s27, 4  ;;  %s1555_s28 = int_to_ptr.vmem [resolvable:$true] %s167_s28 }
  0x12   : > { %s1557_s30 = sshll.u32 %s1468_s29, 4  ;;  %s1276_s7 = scalar_lea.hbm %s1800_s1, 256  ;;  %s181_s30 = int_to_ptr.vmem [resolvable:$true] %s1557_s30 }
  0x13   : > { %p1551_p11 = pnand %p1211_p9, %p1804_p1  ;;  %p1277_p12 = scmp.ne.s32.totalorder %s1800_s1, %s1276_s7 }
  0x14   : > { %p1283_p5 = scmp.lt.u32.totalorder %s1276_s7, %s1800_s1 }
  0x15   : > { %p1567_p13 = pneg %p1551_p11 }
  0x17   : > { %p1279_p0 = pnand %p1567_p13, %p1277_p12 }
  0x19   : > { %p1280_p3 = pneg %p1279_p0 }
  0x1b   : > { %p1285_p7 = pnand %p1283_p5, %p1280_p3 }
  0x1d   : > { %1288 = shalt.err (!%p1285_p7)
}
  0x1e   : > { %s1289_s13 = scalar_lea.vmem %s1544_s25, 256  ;;  %p1297_p2 = scmp.lt.s32.totalorder %s1544_s25, %s1544_s25 }
  0x1f   : > { %p1290_p9 = scmp.ne.s32.totalorder %s1544_s25, %s1289_s13  ;;  %p1298_p6 = scmp.lt.s32.totalorder %s1289_s13, %s1289_s13 }
  0x21   : > { %p1292_p10 = pnand %p1290_p9, %p1567_p13  ;;  %p1299_p12 = por %p1298_p6, %p1297_p2 }
  0x23   : > { %p1293_p1 = pneg %p1292_p10 }
  0x25   : > { %p1300_p0 = pnand %p1299_p12, %p1293_p1 }
  0x27   : > { %1303 = shalt.err (!%p1300_p0)
}
  0x28   : > { %s1469_s14 = smov 128   ;;  %s1470_s20 = smov 8  }
  0x29   : > { %1214 = dma.hbm_to_vmem [thread:$0]  (!%p1551_p11), %s1800_s1, 256, %s1544_s25, [#allocation6], %s1469_s14, %s1469_s14, %s1470_s20  }
  0x2a   : > { %s1304_s6 = scalar_lea.hbm %s1801_s2, 256 }
  0x2b   : > { %p1305_p1 = scmp.ne.s32.totalorder %s1801_s2, %s1304_s6  ;;  %p1311_p10 = scmp.lt.u32.totalorder %s1304_s6, %s1801_s2 }
  0x2d   : > { %p1307_p2 = pnand %p1305_p1, %p1567_p13 }
  0x2f   : > { %p1308_p6 = pneg %p1307_p2 }
  0x31   : > { %p1313_p3 = pnand %p1311_p10, %p1308_p6 }
  0x33   : > { %1316 = shalt.err (!%p1313_p3)
}
  0x34   : > { %s1317_s25 = scalar_lea.vmem %s1555_s28, 256  ;;  %p1325_p12 = scmp.lt.s32.totalorder %s1555_s28, %s1555_s28 }
  0x35   : > { %p1318_p5 = scmp.ne.s32.totalorder %s1555_s28, %s1317_s25  ;;  %p1326_p0 = scmp.lt.s32.totalorder %s1317_s25, %s1317_s25 }
  0x37   : > { %p1320_p7 = pnand %p1318_p5, %p1567_p13  ;;  %p1327_p1 = por %p1326_p0, %p1325_p12 }
  0x39   : > { %p1321_p9 = pneg %p1320_p7 }
  0x3b   : > { %p1328_p2 = pnand %p1327_p1, %p1321_p9 }
  0x3d   : > { %1331 = shalt.err (!%p1328_p2)
}
  0x3e   : > { %1217 = dma.hbm_to_vmem [thread:$0]  (!%p1551_p11), %s1801_s2, 256, %s1555_s28, [#allocation6], %s1469_s14, %s1469_s14, %s1470_s20  }
  0x3f   : > { %s1332_s29 = scalar_lea.hbm %s1802_s3, 256 }
  0x40   : > { %p1333_p6 = scmp.ne.s32.totalorder %s1802_s3, %s1332_s29  ;;  %p1339_p5 = scmp.lt.u32.totalorder %s1332_s29, %s1802_s3 }
  0x42   : > { %p1335_p10 = pnand %p1333_p6, %p1567_p13 }
  0x44   : > { %p1336_p3 = pneg %p1335_p10 }
  0x46   : > { %p1341_p7 = pnand %p1339_p5, %p1336_p3 }
  0x48   : > { %1344 = shalt.err (!%p1341_p7)
}
  0x49   : > { %s1345_s9 = scalar_lea.vmem %s181_s30, 256  ;;  %p1353_p1 = scmp.lt.s32.totalorder %s181_s30, %s181_s30 }
  0x4a   : > { %p1346_p9 = scmp.ne.s32.totalorder %s181_s30, %s1345_s9  ;;  %p1354_p2 = scmp.lt.s32.totalorder %s1345_s9, %s1345_s9 }
  0x4c   : > { %p1348_p12 = pnand %p1346_p9, %p1567_p13  ;;  %p1355_p4 = por %p1354_p2, %p1353_p1 }
  0x4e   : > { %p1349_p0 = pneg %p1348_p12 }
  0x50   : > { %p1356_p8 = pnand %p1355_p4, %p1349_p0 }
  0x52   : > { %1359 = shalt.err (!%p1356_p8)
}
  0x53   : > { %1220 = dma.hbm_to_vmem [thread:$0]  (!%p1551_p11), %s1802_s3, 256, %s181_s30, [#allocation9], %s1469_s14, %s1469_s14, %s1470_s20  }
  0x54   : > { %s1640_s10 = sadd.s32 1, %s1464_s18   ;;  %s29_s25 = sadd.s32 1, %s1460_s17 }
  0x55   : > { %s26_s26 = ssub.s32 %s1464_s18, %s1640_s10  ;;  %p36_p8 = scmp.ne.s32.totalorder %s1460_s17, %s1456_s16 }
  0x56   : > { %p27_p4 = scmp.eq.s32.totalorder %s26_s26, 0  ;;  %p37_p13 = scmp.eq.s32.totalorder %s1464_s18, 0 }
  0x57   : > { %p1232_p6 = scmp.lt.s32.totalorder %s1464_s18, 2  ;;  %p1812_p3 = scmp.eq.s32.totalorder %s1521_s19, 1 }
  0x58   : > { %s1650_s12 = scalar_select %p27_p4, %s1460_s17, %s29_s25  }
  0x59   : > { %p38_p10 = por %p37_p13, %p36_p8  ;;  %p1654_p5 = por %p1812_p3, %p36_p8 }
  0x5a   : > { %s194_s24 = sand.u32 1, %s1460_s17   ;;  %s1072_s27 = sshll.u32 %s1464_s18, 10 }
  0x5b   : > { %s1039_s30 = sshll.u32 %s194_s24, 6  ;;  %s1663_s6 = scalar_lea.hbm %s1799_s0, %s1072_s27 }
  0x5c   : > { %s198_s7 = scalar_lea.vmem [#allocation2], %s1039_s30  ;;  %p1665_p11 = pnand %p1232_p6, %p38_p10 }
  0x5d   : > { %s206_s8 = sshll.u32 %s198_s7, 4  ;;  %s1671_s28 = scalar_lea.sflag [#allocation3], %s194_s24  ;;  %s1669_s8 = int_to_ptr.vmem [resolvable:$true] %s206_s8 }
  0x5e   : > { %s1360_s11 = scalar_lea.hbm %s1663_s6, 1024  ;;  %p1362_p9 = pneg %p1665_p11 }
  0x5f   : > { %p1361_p7 = scmp.ne.s32.totalorder %s1663_s6, %s1360_s11  ;;  %s1365_s27 = scalar_lea.hbm %s1799_s0, 2048 }
  0x60   : > { %p1366_p1 = scmp.lt.u32.totalorder %s1663_s6, %s1799_s0  ;;  %p1367_p2 = scmp.lt.u32.totalorder %s1365_s27, %s1360_s11 }
  0x61   : > { %p1363_p12 = pnand %p1362_p9, %p1361_p7  ;;  %p1369_p8 = scmp.lt.u32.totalorder %s1360_s11, %s1663_s6 }
  0x62   : > { %p1368_p4 = por %p1367_p2, %p1366_p1 }
  0x63   : > { %p1364_p0 = pneg %p1363_p12 }
  0x64   : > { %p1370_p13 = por %p1369_p8, %p1368_p4 }
  0x66   : > { %p1371_p6 = pnand %p1370_p13, %p1364_p0 }
  0x68   : > { %1374 = shalt.err (!%p1371_p6)
}
  0x69   : > { %s1375_s24 = scalar_lea.vmem %s1669_s8, 1024  ;;  %s1471_s5 = smov [#allocation2]  }
  0x6a   : > { %p1376_p10 = scmp.ne.s32.totalorder %s1669_s8, %s1375_s24  ;;  %s1380_s7 = sshll.u32 %s1471_s5, 4  ;;  %s1381_s7 = int_to_ptr.vmem [resolvable:$false] %s1380_s7 }
  0x6b   : > { %s1382_s26 = scalar_lea.vmem %s1381_s7, 2048  ;;  %p1383_p12 = scmp.lt.s32.totalorder %s1669_s8, %s1381_s7 }
  0x6c   : > { %p1378_p3 = pnand %p1376_p10, %p1362_p9  ;;  %p1384_p1 = scmp.lt.s32.totalorder %s1382_s26, %s1375_s24 }
  0x6e   : > { %p1379_p7 = pneg %p1378_p3  ;;  %p1385_p2 = por %p1384_p1, %p1383_p12 }
  0x70   : > { %p1386_p4 = pnand %p1385_p2, %p1379_p7 }
  0x72   : > { %1389 = shalt.err (!%p1386_p4)
}
  0x73   : > { %1224 = dma.hbm_to_vmem [thread:$0]  (!%p1665_p11), %s1663_s6, 1024, %s1669_s8, %s1671_s28, %s1469_s14, %s1469_s14, %s1470_s20  }
  0x74   : > { %p1815_p9 = scmp.ne.s32.totalorder %s1809_s23, 0 }
  0x75   : > { %s1705_s11 = sand.u32 (!%p1815_p9), 1, %s1456_s16   ;;  %p1816_p0 = scmp.ne.s32.totalorder (!%p1815_p9), %s1807_s21, 0 }
  0x76   : > { %218 = sbr.rel (%p1815_p9) target bundleno = 594 (0x252), region = 36  ;;  %s1044_s25 = sshll.u32 (!%p1815_p9), %s1705_s11, 6 }
  0x77   : > { %s221_s27 = scalar_lea.sflag (!%p1815_p9), [#allocation3], %s1705_s11  ;;  %s224_s9 = scalar_lea.vmem (!%p1815_p9), [#allocation2], %s1044_s25 }
  0x7d   : > { %1435 = dma.done.wait (%p1816_p0), %s221_s27, 1024  }
  0x7e   : > { %1437 = vsyncadd (%p1816_p0), %s221_s27, 4294966272  ;;  %p1817_p11 = scmp.eq.s32.totalorder %s1521_s19, 0 }
  0x80   : > { %1439 = dma.done.wait (%p1817_p11), [#allocation6], 512   ;;  %p1818_p8 = pmov %p1817_p11 }
  0x82   : > { %1441 = vsyncadd (%p1818_p8), [#allocation6], 4294966784  ;;  %p1819_p13 = pmov %p1818_p8 }
  0x83   : > { %p1820_p6 = pmov %p1818_p8 }
  0x84   : > { %1443 = dma.done.wait (%p1819_p13), [#allocation9], 256  }
  0x85   : > { %1445 = vsyncadd (%p1820_p6), [#allocation9], 4294967040  ;;  %vm275_vm0 = vcmask 130048   ;;  %v271_v0 = vld [vmem:[#allocation7] sm:$0xff]  ;;  %v272_v1 = vld [vmem:[#allocation7 + $0x8] sm:$0xff]  ;;  %s260_s21 = scalar_lea.vmem [#allocation10], %s1044_s25 }
  0x86   : > { %v263_v2 = vld [vmem:[%s224_s9] sm:$0xff]  ;;  %v1163_v3 = vpack.c.bf16 %v272_v1, %v271_v0  ;;  %v265_v4 = vld [vmem:[%s224_s9 + $0x10] sm:$0xff]  ;;  %v264_v5 = vld [vmem:[%s224_s9 + $0x8] sm:$0xff]  ;;  %s1074_s23 = sshll.u32 %s1521_s19, 10  ;;  %s931_s14 = sshll.u32 %s260_s21, 4  ;;  %s1751_s14 = int_to_ptr.vmem [resolvable:$true] %s931_s14 }
  0x87   : > { %1111 = vmatprep.mubr.msk.f32.mxu0 %vm275_vm0, %v263_v2  ;;  %1118 = vmatprep.mubr.msk.f32.mxu1 %vm275_vm0, %v265_v4  ;;  %v266_v6 = vld [vmem:[%s224_s9 + $0x18] sm:$0xff]  ;;  %v267_v7 = vld [vmem:[%s224_s9 + $0x20] sm:$0xff]  ;;  %v269_v8 = vld [vmem:[%s224_s9 + $0x30] sm:$0xff]  ;;  %s1749_s8 = scalar_lea.hbm %s1803_s4, %s1074_s23  ;;  %s917_s19 = scalar_lea.sflag [#allocation4], %s1705_s11 }
  0x88   : > { %1164 = vmatprep.subr.bf16.mxu0 %v1163_v3  ;;  %1168 = vmatprep.subr.bf16.mxu1 %v1163_v3  ;;  %v268_v9 = vld [vmem:[%s224_s9 + $0x28] sm:$0xff]  ;;  %v270_v10 = vld [vmem:[%s224_s9 + $0x38] sm:$0xff]  ;;  %v273_v11 = vld [vmem:[#allocation5] sm:$0xff]  ;;  %s1390_s28 = scalar_lea.vmem %s1751_s14, 1024  ;;  %s1472_s30 = smov [#allocation10]  }
  0x89   : > { %1166 = vmatpush3.bf16.msra.mxu0 %v1163_v3  ;;  %1170 = vmatpush3.bf16.msra.mxu1 %v1163_v3  ;;  %v274_v22 = vld [vmem:[#allocation5 + $0x8] sm:$0xff]  ;;  %v600_v26 = vld [vmem:[#allocation8] sm:$0xff]  ;;  %p1391_p10 = scmp.ne.s32.totalorder %s1751_s14, %s1390_s28  ;;  %s1394_s29 = sshll.u32 %s1472_s30, 4  ;;  %s1395_s29 = int_to_ptr.vmem [resolvable:$false] %s1394_s29 }
  0x8a   : > { %1172 = vmatprep.subr.bf16.mxu0 %v1163_v3  ;;  %1176 = vmatprep.subr.bf16.mxu1 %v1163_v3  ;;  %v601_v25 = vld [vmem:[#allocation8 + $0x8] sm:$0xff]  ;;  %s1396_s24 = scalar_lea.vmem %s1395_s29, 2048  ;;  %p1397_p12 = scmp.lt.s32.totalorder %s1751_s14, %s1395_s29 }
  0x8b   : > { %p1392_p3 = pnand %p1391_p10, %p1654_p5  ;;  %p1398_p1 = scmp.lt.s32.totalorder %s1396_s24, %s1390_s28 }
  0x8c   : > { %1112 = vmatmul.mubr.msk.f32.vlgmr.msra.gmra.mrb[0].mxu0 %vm275_vm0, %v264_v5  ;;  %1119 = vmatmul.mubr.msk.f32.vlgmr.msra.gmra.mrb[0].mxu1 %vm275_vm0, %v266_v6 }
  0x8d   : > { %1174 = vmatpush3.bf16.msra.mxu0 %v1163_v3  ;;  %1178 = vmatpush3.bf16.msra.mxu1 %v1163_v3  ;;  %p1393_p7 = pneg %p1392_p3  ;;  %p1399_p2 = por %p1398_p1, %p1397_p12 }
  0x8e   : > { %1125 = vmatprep.mubr.msk.f32.mxu0 %vm275_vm0, %v267_v7  ;;  %1132 = vmatprep.mubr.msk.f32.mxu1 %vm275_vm0, %v269_v8 }
  0x8f   : > { %p1400_p4 = pnand %p1399_p2, %p1393_p7 }
  0x90   : > { %1126 = vmatmul.mubr.msk.f32.vlgmr.msra.gmra.mrb[2].mxu0 %vm275_vm0, %v268_v9  ;;  %1133 = vmatmul.mubr.msk.f32.vlgmr.msra.gmra.mrb[2].mxu1 %vm275_vm0, %v270_v10 }
  0x91   : > { %1139 = vmatprep.mubr.msk.f32.mxu0 %vm275_vm0, %v273_v11  ;;  %1146 = vmatprep.mubr.msk.f32.mxu1 %vm275_vm0, %v273_v11 }
 0x15f   : > { %v1113_v12 = vpop.f32.mrb[0].mxu0  ;;  %v1120_v13 = vpop.f32.mrb[0].mxu1 }
 0x160   : > { %v348_v14 = vpop.f32.mrb[1].mxu0  ;;  %v429_v15 = vpop.f32.mrb[1].mxu1 }
 0x161   : > { %v1179_v16 = vpack.c.bf16 %v1113_v12, %v348_v14  ;;  %v1183_v17 = vpack.c.bf16 %v1120_v13, %v429_v15 }
 0x163   : > { %v1127_v18 = vpop.f32.mrb[2].mxu0  ;;  %v1134_v19 = vpop.f32.mrb[2].mxu1  ;;  %1180 = vmatprep.subr.bf16.mxu0 %v1179_v16  ;;  %1184 = vmatprep.subr.bf16.mxu1 %v1183_v17 }
 0x164   : > { %v510_v20 = vpop.f32.mrb[3].mxu0  ;;  %v591_v21 = vpop.f32.mrb[3].mxu1  ;;  %1182 = vmatpush3.bf16.msra.mxu0 %v1179_v16  ;;  %1186 = vmatpush3.bf16.msra.mxu1 %v1183_v17 }
 0x165   : > { %v1187_v23 = vpack.c.bf16 %v1127_v18, %v510_v20  ;;  %v1191_v24 = vpack.c.bf16 %v1134_v19, %v591_v21 }
 0x167   : > { %1140 = vmatmul.mubr.msk.f32.vlgmr.msra.gmra.mrb[4].mxu0 %vm275_vm0, %v274_v22  ;;  %1147 = vmatmul.mubr.msk.f32.vlgmr.msra.gmra.mrb[4].mxu1 %vm275_vm0, %v274_v22 }
 0x168   : > { %1188 = vmatprep.subr.bf16.mxu0 %v1187_v23  ;;  %1192 = vmatprep.subr.bf16.mxu1 %v1191_v24 }
 0x169   : > { %1190 = vmatpush3.bf16.msra.mxu0 %v1187_v23  ;;  %1194 = vmatpush3.bf16.msra.mxu1 %v1191_v24 }
 0x16a   : > { %1153 = vmatprep.mubr.msk.f32.mxu0 %vm275_vm0, %v273_v11  ;;  %1160 = vmatprep.mubr.msk.f32.mxu1 %vm275_vm0, %v273_v11 }
 0x16c   : > { %1154 = vmatmul.mubr.msk.f32.vlgmr.msra.gmra.mrb[6].mxu0 %vm275_vm0, %v274_v22  ;;  %1161 = vmatmul.mubr.msk.f32.vlgmr.msra.gmra.mrb[6].mxu1 %vm275_vm0, %v274_v22 }
 0x23a   : > { %v1141_v27 = vpop.f32.mrb[4].mxu0  ;;  %v1148_v28 = vpop.f32.mrb[4].mxu1 }
 0x23b   : > { %v680_v29 = vadd.f32 %v1141_v27, %v601_v25  ;;  %v755_v30 = vadd.f32 %v1148_v28, %v601_v25  ;;  %v674_v31 = vpop.f32.mrb[5].mxu0  ;;  %v749_v32 = vpop.f32.mrb[5].mxu1 }
 0x23c   : > { %v675_v33 = vadd.f32 %v674_v31, %v600_v26  ;;  %v750_v34 = vadd.f32 %v749_v32, %v600_v26 }
 0x23d   : > { %909 = vst.msk [vmem:[%s260_s21 + $0x8] sm:$0xff] %vm275_vm0, %v680_v29  ;;  %911 = vst.msk [vmem:[%s260_s21 + $0x18] sm:$0xff] %vm275_vm0, %v755_v30 }
 0x23e   : > { %908 = vst.msk [vmem:[%s260_s21] sm:$0xff] %vm275_vm0, %v675_v33  ;;  %910 = vst.msk [vmem:[%s260_s21 + $0x10] sm:$0xff] %vm275_vm0, %v750_v34 }
 0x23f   : > { %v1155_v35 = vpop.f32.mrb[6].mxu0  ;;  %v1162_v36 = vpop.f32.mrb[6].mxu1 }
 0x240   : > { %v830_v37 = vadd.f32 %v1155_v35, %v601_v25  ;;  %v905_v38 = vadd.f32 %v1162_v36, %v601_v25  ;;  %v824_v39 = vpop.f32.mrb[7].mxu0  ;;  %v899_v40 = vpop.f32.mrb[7].mxu1 }
 0x241   : > { %v825_v41 = vadd.f32 %v824_v39, %v600_v26  ;;  %v900_v42 = vadd.f32 %v899_v40, %v600_v26 }
 0x242   : > { %913 = vst.msk [vmem:[%s260_s21 + $0x28] sm:$0xff] %vm275_vm0, %v830_v37  ;;  %915 = vst.msk [vmem:[%s260_s21 + $0x38] sm:$0xff] %vm275_vm0, %v905_v38 }
 0x243   : > { %912 = vst.msk [vmem:[%s260_s21 + $0x20] sm:$0xff] %vm275_vm0, %v825_v41  ;;  %914 = vst.msk [vmem:[%s260_s21 + $0x30] sm:$0xff] %vm275_vm0, %v900_v42 }
 0x244   : > { %1403 = shalt.err (!%p1400_p4)
}
 0x245   : > { %s1404_s5 = scalar_lea.hbm %s1749_s8, 1024  ;;  %s1408_s25 = scalar_lea.hbm %s1803_s4, 2048 }
 0x246   : > { %p1405_p9 = scmp.ne.s32.totalorder %s1749_s8, %s1404_s5  ;;  %p1409_p8 = scmp.lt.u32.totalorder %s1749_s8, %s1803_s4 }
 0x247   : > { %p1410_p13 = scmp.lt.u32.totalorder %s1408_s25, %s1404_s5  ;;  %p1412_p10 = scmp.lt.u32.totalorder %s1404_s5, %s1749_s8 }
 0x248   : > { %p1406_p0 = pnand %p1405_p9, %p1654_p5 }
 0x249   : > { %p1411_p6 = por %p1410_p13, %p1409_p8 }
 0x24a   : > { %p1407_p11 = pneg %p1406_p0 }
 0x24b   : > { %p1413_p3 = por %p1412_p10, %p1411_p6 }
 0x24d   : > { %p1414_p7 = pnand %p1413_p3, %p1407_p11 }
 0x24f   : > { %1417 = shalt.err (!%p1414_p7)
}
 0x250   : > { %s1473_s21 = smov 128   ;;  %s1474_s23 = smov 8  }
 0x251   : > { %1209 = dma.vmem_to_hbm [thread:$0]  (%p1654_p5), %s1751_s14, 1024, %s1749_s8, %s917_s19, %s1473_s21, %s1473_s21, %s1474_s23  }
 0x252 PF: > { %s946_s20 = sand.u32 1, %s1452_s15   ;;  %p1821_p12 = scmp.ne.s32.totalorder %s1808_s22, 0 }
 0x253   : > { %p1822_p1 = scmp.ge.s32.totalorder %s1464_s18, 2  ;;  %s947_s6 = scalar_lea.sflag [#allocation4], %s946_s20 }
 0x255   : > { %p1226_p2 = pnand %p1822_p1, %p1821_p12 }
 0x257   : > { %1447 = dma.done.wait (!%p1226_p2), %s947_s6, 1024  }
 0x258   : > { %1449 = vsyncadd (!%p1226_p2), %s947_s6, 4294966272  ;;  %p19_p4 = scmp.ge.s32.totalorder %s1640_s10, 4   ;;  %s1823_s15 = smov %s1456_s16 }
 0x259   : > { %s1824_s16 = smov %s1460_s17  ;;  %s1825_s17 = smov %s1650_s12 }
 0x25a   : > { %s1826_s18 = smov %s1640_s10  ;;  %21 = sbr.rel (!%p19_p4) target bundleno = 7 (0x7), region = 93 }
 0x261   :  { %952 = vsyncpa [#allocation3], 1 }
 0x262   :  { %954 = vsyncpa [#allocation3 + $0x1], 1 }
 0x263   :  { %955 = vsyncpa [#allocation6], 1 }
 0x264   :  { %956 = vsyncpa [#allocation9], 1 }
 0x265   :  { %957 = vsyncpa [#allocation4], 1 }
 0x266   :  { %959 = vsyncpa [#allocation4 + $0x1], 1 }

</bundles_post_ra>
